<compile_context>
chip_gen: v7x
topology: tpu7x:2x2x1
jax: 0.10.0
libtpu: 0.0.40
codegen_flags: <defaults>
</compile_context>

<pallas_src>
import functools
from typing import NamedTuple

import jax
import jax.numpy as jnp
from jax.experimental import pallas as pl
from jax.experimental.pallas import tpu as pltpu

EPS = 1e-8
_LANE = 128
_MAX_TK = 2048          # K-tile upper bound (512-2048 is the measured sweet spot)


class ReadoutPlan(NamedTuple):
    K: int
    O: int
    k_eff: int
    o_eff: int
    tk: int
    to: int
    single: bool
    n_contract: int
    vmem_limit: int


# ---------------------------------------------------------------------------
# Kernels (norm is precomputed -> pure matmul + multiply/subtract epilogue)
# ---------------------------------------------------------------------------
def _readout_kernel_single(x_ref, w_ref, inv_ref, b_ref, out_ref):
    """Whole K in one step.  Grid axis 0 iterates over O tiles ('parallel')."""
    h = jnp.dot(x_ref[...], w_ref[...], preferred_element_type=jnp.float32)
    out_ref[...] = (h * inv_ref[...] - b_ref[...]).astype(out_ref.dtype)


def _readout_kernel_tiled(x_ref, w_ref, inv_ref, b_ref, out_ref, acc_ref):
    """Grid = (O tiles ['parallel'], K tiles ['arbitrary'] -- reduction last)."""
    k = pl.program_id(1)

    @pl.when(k == 0)
    def _():
        acc_ref[...] = jnp.zeros_like(acc_ref)

    acc_ref[...] += jnp.dot(x_ref[...], w_ref[...],
                            preferred_element_type=jnp.float32)

    @pl.when(k == pl.num_programs(1) - 1)
    def _():
        out_ref[...] = (acc_ref[...] * inv_ref[...]
                        - b_ref[...]).astype(out_ref.dtype)


# ---------------------------------------------------------------------------
# Planning helpers
# ---------------------------------------------------------------------------
def _round_up(n, m):
    return (n + m - 1) // m * m


def _hw():
    try:
        cap = int(pltpu.get_tpu_info().vmem_capacity_bytes)
    except Exception:
        cap = 64 << 20
    # v7x is the only generation with 64 MiB per-core VMEM and 2 TensorCores.
    n_cores = 2 if cap <= (64 << 20) else 1
    return cap, n_cores


def _vmem_hard_cap(cap):
    if cap <= (64 << 20):               # v7x: leave real headroom under 64 MiB
        return min(cap - (12 << 20), 52 << 20)
    return (cap * 9) // 10              # v5e / v6e (128 MiB)


def _choose_out_tile(o_eff, n_cores):
    if o_eff % _LANE != 0:
        return o_eff                    # tiny O: one full-extent (masked) tile
    cands = [c for c in (1024, 512, 256, 128) if c <= o_eff and o_eff % c == 0]
    if n_cores >= 2:
        for c in cands:                 # give every TensorCore >= 1 O tile
            if o_eff // c >= n_cores:
                return c
        return cands[-1]
    return cands[0]                     # 1 TC: fewer, bigger DMAs


def _make_plan(batch_hint, K, O, x_itemsize, w_itemsize, out_itemsize,
               n_contract, force_tiled=False, tk_override=None):
    cap, n_cores = _hw()
    hard = _vmem_hard_cap(cap)
    stream_budget = (hard * 3) // 5     # budget for the double-buffered x/w tiles

    # --- O handling: never inflate the w stream for tiny O -------------------
    if O % _LANE == 0:
        o_eff = O
    elif _round_up(O, _LANE) <= 2 * O:
        o_eff = _round_up(O, _LANE)     # cheap pad -> unmasked lane-dense stores
    else:
        o_eff = O                       # tiny O: full-extent block, masked store
    to = _choose_out_tile(o_eff, n_cores)

    M = max(1, int(batch_hint))
    single_ws = 2 * M * K * x_itemsize + 2 * K * to * w_itemsize
    single = (not force_tiled) and (tk_override is None) and \
             single_ws <= stream_budget

    if single:
        tk, k_eff = K, K
        ws = single_ws + 2 * M * to * out_itemsize + 4 * to * 4
    else:
        k128 = _round_up(K, _LANE)
        if tk_override is not None:
            tk = min(_round_up(int(tk_override), _LANE), k128)
        else:
            denom = max(1, 2 * (M * x_itemsize + to * w_itemsize))
            tk_fit = (stream_budget // denom) // _LANE * _LANE
            tk_fit = max(_LANE, min(_MAX_TK, tk_fit, k128))
            # Prefer a tile dividing round_up(K,128): no extra K pad of w.
            tk = next((t for t in range(tk_fit, _LANE - 1, -_LANE)
                       if k128 % t == 0), _LANE)
            if tk < max(_LANE, tk_fit // 4):
                tk = tk_fit             # divisor too small -> accept one-time pad
        k_eff = _round_up(K, tk)
        ws = (2 * M * tk * x_itemsize + 2 * tk * to * w_itemsize
              + 2 * M * to * out_itemsize + 4 * to * 4 + M * to * 4)

    vmem_limit = int(min(hard, max(32 << 20, 2 * ws)))
    return ReadoutPlan(K=K, O=O, k_eff=k_eff, o_eff=o_eff, tk=tk, to=to,
                       single=bool(single), n_contract=n_contract,
                       vmem_limit=vmem_limit)


# ---------------------------------------------------------------------------
# One-time parameter preparation (outside the per-step hot path)
# ---------------------------------------------------------------------------
def prepare_readout_params(w, b, *, batch_hint=8, x_dtype=jnp.float32,
                           weight_dtype=None, force_tiled=False, tk=None):
    """Call ONCE per parameter update: reshape w to [K,O], pad O/K as planned,
    optionally cast w to a narrower MXU dtype, and precompute
    inv_norm = 1/(sum(w^2)+eps).  Keeps the per-call path free of pad / cast /
    norm HLOs (each per-call pad of w costs a full extra HBM pass over w)."""
    O = int(w.shape[-1])
    n_contract = w.ndim - 1
    w2 = jnp.asarray(w, jnp.float32).reshape(-1, O)
    K = int(w2.shape[0])

    w_itemsize = (jnp.dtype(weight_dtype).itemsize if weight_dtype is not None
                  else w2.dtype.itemsize)
    x_itemsize = w_itemsize if weight_dtype is not None \
        else jnp.dtype(x_dtype).itemsize
    out_itemsize = jnp.dtype(x_dtype).itemsize
    plan = _make_plan(batch_hint, K, O, x_itemsize, w_itemsize, out_itemsize,
                      n_contract, force_tiled=force_tiled, tk_override=tk)

    # inv_norm from the exact f32 weights (matches the PyTorch reference).
    inv_norm = (1.0 / (jnp.sum(w2 * w2, axis=0, keepdims=True) + EPS))
    inv_norm = inv_norm.astype(jnp.float32)
    b2 = jnp.asarray(b, jnp.float32).reshape(1, O)

    if plan.o_eff != O:
        pad_o = plan.o_eff - O
        w2 = jnp.pad(w2, ((0, 0), (0, pad_o)))
        inv_norm = jnp.pad(inv_norm, ((0, 0), (0, pad_o)))   # padded cols -> 0
        b2 = jnp.pad(b2, ((0, 0), (0, pad_o)))
    if plan.k_eff != K:
        w2 = jnp.pad(w2, ((0, plan.k_eff - K), (0, 0)))
    if weight_dtype is not None:
        w2 = w2.astype(weight_dtype)

    return plan, jax.device_put(w2), jax.device_put(inv_norm), jax.device_put(b2)


# ---------------------------------------------------------------------------
# Forward
# ---------------------------------------------------------------------------
@functools.partial(jax.jit, static_argnames=("plan",))
def dense_spiking_readout_mean(x, w2, inv_norm2, b2, *, plan: ReadoutPlan,
                               mem=None):
    """Forward of DenseSpikingReadoutLayer (time_reduction='mean').

    x: [..., C, D] (in_channels > 0) or [..., D] (in_channels == 0).  All
    leading dims are flattened into the matmul M dimension, so callers can
    stack timesteps/microbatches to amortize the weight stream.
    Returns (out shaped lead + (O,), dtype x.dtype; mem unchanged)."""
    out_dtype = x.dtype
    lead = x.shape[: x.ndim - plan.n_contract]
    M = 1
    for d in lead:
        M *= int(d)
    x2 = x.reshape(M, -1)
    if x2.shape[1] != plan.K:
        raise ValueError(
            f"x contraction size {x2.shape[1]} does not match plan K={plan.K}")
    if x2.dtype != w2.dtype:
        x2 = x2.astype(w2.dtype)        # match MXU operand dtype (e.g. bf16)

    o_eff, to = plan.o_eff, plan.to
    cp = pltpu.CompilerParams(
        dimension_semantics=(("parallel",) if plan.single
                             else ("parallel", "arbitrary")),
        vmem_limit_bytes=plan.vmem_limit,
    )

    if plan.single:
        out = pl.pallas_call(
            _readout_kernel_single,
            out_shape=jax.ShapeDtypeStruct((M, o_eff), out_dtype),
            grid_spec=pltpu.PrefetchScalarGridSpec(
                num_scalar_prefetch=0,
                grid=(o_eff // to,),
                in_specs=[
                    pl.BlockSpec((M, plan.K), lambda o: (0, 0)),   # x resident
                    pl.BlockSpec((plan.K, to), lambda o: (0, o)),  # w over O
                    pl.BlockSpec((1, to), lambda o: (0, o)),       # inv_norm
                    pl.BlockSpec((1, to), lambda o: (0, o)),       # bias
                ],
                out_specs=pl.BlockSpec((M, to), lambda o: (0, o)),
            ),
            compiler_params=cp,
        )(x2, w2, inv_norm2, b2)
    else:
        if plan.k_eff != plan.K:
            # x is tiny next to w; this per-call pad is cheap (w was padded
            # once at prepare_readout_params time).
            x2 = jnp.pad(x2, ((0, 0), (0, plan.k_eff - plan.K)))
        tk = plan.tk
        out = pl.pallas_call(
            _readout_kernel_tiled,
            out_shape=jax.ShapeDtypeStruct((M, o_eff), out_dtype),
            grid_spec=pltpu.PrefetchScalarGridSpec(
                num_scalar_prefetch=0,
                grid=(o_eff // to, plan.k_eff // tk),    # K reduction last
                in_specs=[
                    pl.BlockSpec((M, tk), lambda o, k: (0, k)),
                    pl.BlockSpec((tk, to), lambda o, k: (k, o)),
                    pl.BlockSpec((1, to), lambda o, k: (0, o)),
                    pl.BlockSpec((1, to), lambda o, k: (0, o)),
                ],
                out_specs=pl.BlockSpec((M, to), lambda o, k: (0, o)),
                scratch_shapes=[pltpu.VMEM((M, to), jnp.float32)],
            ),
            compiler_params=cp,
        )(x2, w2, inv_norm2, b2)

    if o_eff != plan.O:
        out = out[:, :plan.O]
    out = out.reshape(lead + (plan.O,))
    # 'mean' reduction: membrane state passes through untouched.
    return out, mem


# ---------------------------------------------------------------------------
# Parameter init mirroring reset_parameters() / clamp()
# ---------------------------------------------------------------------------
def init_params(key, in_channels, input_shape, output_shape,
                w_init_mean=0.0, w_init_std=0.15, b_init=1.0):
    kw, kb = jax.random.split(key)
    w_std = w_init_std * (1.0 / input_shape) ** 0.5
    if in_channels == 0:
        w_shape = (input_shape, output_shape)
    else:
        w_shape = (in_channels, input_shape, output_shape)
    w = w_init_mean + w_std * jax.random.normal(kw, w_shape, dtype=jnp.float32)
    b = b_init + 0.01 * jax.random.normal(kb, (output_shape,), dtype=jnp.float32)
    b = jnp.clip(b, 0.0, None)          # clamp(min=0.0)
    return w, b


if __name__ == "__main__":
    key = jax.random.PRNGKey(0)
    kx, kp, kx2, kp2 = jax.random.split(key, 4)

    # --- Case 1: in_channels > 0 path, tiny O (O is NOT lane-padded) --------
    B, C, D, O = 8, 4, 64, 10
    x = jax.random.normal(kx, (B, C, D), dtype=jnp.float32)
    w, b = init_params(kp, in_channels=C, input_shape=D, output_shape=O)

    h_ref = jnp.einsum("abc,bcd->ad", x, w)
    norm_ref = jnp.sum(w * w, axis=(0, 1))
    out_ref = (h_ref / (norm_ref + EPS) - b).astype(x.dtype)

    # 1a) f32, auto plan: K = 256 is small -> single-shot kernel.
    plan, w2, inv2, b2 = prepare_readout_params(w, b, batch_hint=B)
    out, mem = dense_spiking_readout_mean(x, w2, inv2, b2, plan=plan)
    out = jax.block_until_ready(out)
    assert out.shape == (B, O) and out.dtype == x.dtype and mem is None
    assert plan.single and plan.o_eff == O
    assert jnp.allclose(out, out_ref, atol=3e-5, rtol=3e-5), "single-shot mismatch"

    # 1b) forced tiled-K accumulator kernel (exercises the big-K path).
    plan_t, w2t, inv2t, b2t = prepare_readout_params(
        w, b, batch_hint=B, force_tiled=True, tk=128)
    out_t, _ = dense_spiking_readout_mean(x, w2t, inv2t, b2t, plan=plan_t)
    out_t = jax.block_until_ready(out_t)
    assert (not plan_t.single) and plan_t.tk == 128
    assert jnp.allclose(out_t, out_ref, atol=3e-5, rtol=3e-5), "tiled-K mismatch"

    # 1c) bf16 MXU operands (halves the w HBM stream); looser tolerance.
    plan_h, w2h, inv2h, b2h = prepare_readout_params(
        w, b, batch_hint=B, weight_dtype=jnp.bfloat16)
    out_h, _ = dense_spiking_readout_mean(x, w2h, inv2h, b2h, plan=plan_h)
    out_h = jax.block_until_ready(out_h)
    assert out_h.dtype == x.dtype
    assert jnp.allclose(out_h, out_ref, atol=2e-1, rtol=5e-2), "bf16 mismatch"

    # --- Case 2: in_channels == 0 path (2-D x), O=100 padded to 128 ---------
    B2, D2, O2 = 8, 128, 100
    x_b = jax.random.normal(kx2, (B2, D2), dtype=jnp.float32)
    w_b, b_b = init_params(kp2, in_channels=0, input_shape=D2, output_shape=O2)
    h2 = jnp.einsum("ab,bc->ac", x_b, w_b)
    out_ref2 = (h2 / (jnp.sum(w_b * w_b, axis=0) + EPS) - b_b).astype(x_b.dtype)

    plan2, w22, inv22, b22 = prepare_readout_params(w_b, b_b, batch_hint=B2)
    out2, _ = dense_spiking_readout_mean(x_b, w22, inv22, b22, plan=plan2)
    out2 = jax.block_until_ready(out2)
    assert out2.shape == (B2, O2) and plan2.o_eff == 128
    assert jnp.allclose(out2, out_ref2, atol=3e-5, rtol=3e-5), "padded-O mismatch"

    print("KERNEL_OK")
</pallas_src>

<mosaic_0001>
module attributes {stable_mosaic.version = 11 : i64} {
  func.func @_readout_kernel_single(%arg0: i32, %arg1: memref<8x256xf32, #tpu.memory_space<vmem>>, %arg2: memref<256x10xf32, #tpu.memory_space<vmem>>, %arg3: memref<1x10xf32, #tpu.memory_space<vmem>>, %arg4: memref<1x10xf32, #tpu.memory_space<vmem>>, %arg5: memref<8x10xf32, #tpu.memory_space<vmem>>) attributes {dimension_semantics = [#tpu.dimension_semantics<parallel>], iteration_bounds = array<i64: 1>, scalar_prefetch = 0 : i64, scratch_operands = 0 : i64, tpu.core_type = #tpu.core_type<tc>, window_params = [{pipeline_mode = #tpu.pipeline_mode<synchronous>, transform_indices = @transform_0, window_bounds = array<i64: 8, 256>}, {transform_indices = @transform_1, window_bounds = array<i64: 256, 10>}, {transform_indices = @transform_2, window_bounds = array<i64: 1, 10>}, {transform_indices = @transform_3, window_bounds = array<i64: 1, 10>}, {transform_indices = @transform_4, window_bounds = array<i64: 8, 10>}]} {
    %c0 = arith.constant 0 : index
    %c0_0 = arith.constant 0 : index
    %0 = vector.load %arg1[%c0, %c0_0] : memref<8x256xf32, #tpu.memory_space<vmem>>, vector<8x256xf32>
    %c0_1 = arith.constant 0 : index
    %c0_2 = arith.constant 0 : index
    %1 = vector.load %arg2[%c0_1, %c0_2] : memref<256x10xf32, #tpu.memory_space<vmem>>, vector<256x10xf32>
    %cst = arith.constant dense<0.000000e+00> : vector<8x10xf32>
    %2 = tpu.matmul %0, %1, %cst {dimension_numbers = #tpu.dot_dimension_numbers<[1], [0], [0], [1], [0, 0, 1, 1], [], []>} : vector<8x256xf32>, vector<256x10xf32>, vector<8x10xf32> -> vector<8x10xf32>
    %c0_3 = arith.constant 0 : index
    %c0_4 = arith.constant 0 : index
    %3 = vector.load %arg3[%c0_3, %c0_4] : memref<1x10xf32, #tpu.memory_space<vmem>>, vector<1x10xf32>
    %4 = vector.broadcast %3 : vector<1x10xf32> to vector<8x10xf32>
    %5 = arith.mulf %2, %4 : vector<8x10xf32>
    %c0_5 = arith.constant 0 : index
    %c0_6 = arith.constant 0 : index
    %6 = vector.load %arg4[%c0_5, %c0_6] : memref<1x10xf32, #tpu.memory_space<vmem>>, vector<1x10xf32>
    %7 = vector.broadcast %6 : vector<1x10xf32> to vector<8x10xf32>
    %8 = arith.subf %5, %7 : vector<8x10xf32>
    %c0_7 = arith.constant 0 : index
    %c0_8 = arith.constant 0 : index
    %9 = vector.load %arg5[%c0_7, %c0_8] : memref<8x10xf32, #tpu.memory_space<vmem>>, vector<8x10xf32>
    tpu.vector_store %arg5[%c0_7, %c0_8], %8 {strides = array<i32>} : memref<8x10xf32, #tpu.memory_space<vmem>>, vector<8x10xf32>,
    return
  }
  func.func @transform_0(%arg0: i32) -> (i32, i32) {
    %c0_i32 = arith.constant 0 : i32
    %c0_i32_0 = arith.constant 0 : i32
    %c0_i32_1 = arith.constant 0 : i32
    return %c0_i32, %c0_i32_0 : i32, i32
  }
  func.func @transform_1(%arg0: i32) -> (i32, i32) {
    %c0_i32 = arith.constant 0 : i32
    %c0_i32_0 = arith.constant 0 : i32
    return %c0_i32, %arg0 : i32, i32
  }
  func.func @transform_2(%arg0: i32) -> (i32, i32) {
    %c0_i32 = arith.constant 0 : i32
    %c0_i32_0 = arith.constant 0 : i32
    return %c0_i32, %arg0 : i32, i32
  }
  func.func @transform_3(%arg0: i32) -> (i32, i32) {
    %c0_i32 = arith.constant 0 : i32
    %c0_i32_0 = arith.constant 0 : i32
    return %c0_i32, %arg0 : i32, i32
  }
  func.func @transform_4(%arg0: i32) -> (i32, i32) {
    %c0_i32 = arith.constant 0 : i32
    %c0_i32_0 = arith.constant 0 : i32
    return %c0_i32, %arg0 : i32, i32
  }
}

</mosaic_0001>

<bundles_post_ra>
// kernel: dense_spiking_readout_mean.1
= control target key start
LH: loop header
LB: loop body
LE: loop exit
PB: predicated region body
PF: predicated region fallthrough
CT: control target
= control target key end

     0   :  { %s394_s0 = inlined_call_operand.vmem [shape: f32[8,256], index: 0, kind: input, shape index: {}]   ;;  %s395_s1 = inlined_call_operand.vmem [shape: f32[256,10], index: 1, kind: input, shape index: {}]   ;;  %s396_s2 = inlined_call_operand.vmem [shape: f32[1,10], index: 2, kind: input, shape index: {}]   ;;  %s397_s3 = inlined_call_operand.vmem [shape: f32[1,10], index: 3, kind: input, shape index: {}]   ;;  %s398_s4 = inlined_call_operand.hbm [shape: f32[8,10], index: 4, kind: output, shape index: {}]  }
   0x1   :  { %v36_v0 = vld [vmem:[%s395_s1 + $0x80] sm:$0xff]  ;;  %v37_v1 = vld [vmem:[%s395_s1 + $0x88] sm:$0xff]  ;;  %v38_v5 = vld [vmem:[%s395_s1 + $0x90] sm:$0xff] }
   0x2   :  { %v20_v2 = vld [vmem:[%s395_s1] sm:$0xff]  ;;  %v191_v3 = vpack.c.bf16 %v37_v1, %v36_v0  ;;  %v21_v4 = vld [vmem:[%s395_s1 + $0x8] sm:$0xff]  ;;  %v39_v6 = vld [vmem:[%s395_s1 + $0x98] sm:$0xff] }
   0x3   :  { %v193_v7 = vpack.c.bf16 %v21_v4, %v20_v2  ;;  %v195_v8 = vpack.c.bf16 %v39_v6, %v38_v5  ;;  %v22_v9 = vld [vmem:[%s395_s1 + $0x10] sm:$0xff]  ;;  %v23_v10 = vld [vmem:[%s395_s1 + $0x18] sm:$0xff]  ;;  %v40_v11 = vld [vmem:[%s395_s1 + $0xa0] sm:$0xff] }
   0x4   :  { %192 = vmatprep.subr.bf16.mxu0 %v191_v3  ;;  %v41_v12 = vld [vmem:[%s395_s1 + $0xa8] sm:$0xff]  ;;  %v197_v13 = vpack.c.bf16 %v23_v10, %v22_v9  ;;  %v24_v15 = vld [vmem:[%s395_s1 + $0x20] sm:$0xff]  ;;  %v42_v17 = vld [vmem:[%s395_s1 + $0xb0] sm:$0xff] }
   0x5   :  { %194 = vmatpush3.bf16.msra.mxu0 %v193_v7  ;;  %v199_v14 = vpack.c.bf16 %v41_v12, %v40_v11  ;;  %v25_v16 = vld [vmem:[%s395_s1 + $0x28] sm:$0xff]  ;;  %v43_v18 = vld [vmem:[%s395_s1 + $0xb8] sm:$0xff]  ;;  %v26_v21 = vld [vmem:[%s395_s1 + $0x30] sm:$0xff] }
   0x6   :  { %196 = vmatprep.subr.bf16.mxu0 %v195_v8  ;;  %v201_v19 = vpack.c.bf16 %v25_v16, %v24_v15  ;;  %v203_v20 = vpack.c.bf16 %v43_v18, %v42_v17  ;;  %v27_v22 = vld [vmem:[%s395_s1 + $0x38] sm:$0xff]  ;;  %v44_v23 = vld [vmem:[%s395_s1 + $0xc0] sm:$0xff]  ;;  %v45_v24 = vld [vmem:[%s395_s1 + $0xc8] sm:$0xff] }
   0x7   :  { %v19_v25 = vld [vmem:[%s394_s0 + $0x8] sm:$0xff] }
   0x8   :  { %116 = vmatprep.mubr.f32.mxu0 %v19_v25 }
   0x9   :  { %198 = vmatpush3.bf16.msra.mxu0 %v197_v13 }
   0xa   :  { %200 = vmatprep.subr.bf16.mxu0 %v199_v14 }
   0xb   :  { %9 = vsyncpa [#allocation3], 0  ;;  %v205_v26 = vpack.c.bf16 %v27_v22, %v26_v21  ;;  %v207_v27 = vpack.c.bf16 %v45_v24, %v44_v23  ;;  %v28_v28 = vld [vmem:[%s395_s1 + $0x40] sm:$0xff]  ;;  %v29_v29 = vld [vmem:[%s395_s1 + $0x48] sm:$0xff]  ;;  %vm138_vm0 = vcmask 80896  }
   0xc   :  { %v46_v30 = vld [vmem:[%s395_s1 + $0xd0] sm:$0xff]  ;;  %v47_v31 = vld [vmem:[%s395_s1 + $0xd8] sm:$0xff]  ;;  %v209_v32 = vpack.c.bf16 %v29_v29, %v28_v28  ;;  %v48_v36 = vld [vmem:[%s395_s1 + $0xe0] sm:$0xff] }
   0xd   :  { %202 = vmatpush3.bf16.msra.mxu0 %v201_v19  ;;  %v211_v33 = vpack.c.bf16 %v47_v31, %v46_v30  ;;  %v30_v34 = vld [vmem:[%s395_s1 + $0x50] sm:$0xff]  ;;  %v31_v35 = vld [vmem:[%s395_s1 + $0x58] sm:$0xff]  ;;  %v49_v37 = vld [vmem:[%s395_s1 + $0xe8] sm:$0xff] }
   0xe   :  { %204 = vmatprep.subr.bf16.mxu0 %v203_v20  ;;  %v213_v38 = vpack.c.bf16 %v31_v35, %v30_v34  ;;  %v215_v39 = vpack.c.bf16 %v49_v37, %v48_v36  ;;  %v32_v40 = vld [vmem:[%s395_s1 + $0x60] sm:$0xff]  ;;  %v33_v41 = vld [vmem:[%s395_s1 + $0x68] sm:$0xff]  ;;  %v50_v42 = vld [vmem:[%s395_s1 + $0xf0] sm:$0xff] }
   0xf   :  { %v51_v43 = vld [vmem:[%s395_s1 + $0xf8] sm:$0xff]  ;;  %v217_v44 = vpack.c.bf16 %v33_v41, %v32_v40  ;;  %v34_v46 = vld [vmem:[%s395_s1 + $0x70] sm:$0xff]  ;;  %v18_v49 = vld [vmem:[%s394_s0] sm:$0xff] }
  0x10   :  { %v219_v45 = vpack.c.bf16 %v51_v43, %v50_v42  ;;  %v35_v47 = vld [vmem:[%s395_s1 + $0x78] sm:$0xff]  ;;  %v154_v52 = vld [vmem:[%s396_s2] ss:$0 sm:$0xff]  ;;  %s248_s1 = smov [#allocation2]  }
  0x11   :  { %206 = vmatpush3.bf16.msra.mxu0 %v205_v26  ;;  %v221_v48 = vpack.c.bf16 %v35_v47, %v34_v46  ;;  %v155_v54 = vld [vmem:[%s397_s3] ss:$0 sm:$0xff]  ;;  %s146_s9 = sshll.u32 %s248_s1, 4  ;;  %s147_s9 = int_to_ptr.vmem [resolvable:$true] %s146_s9 }
  0x12   :  { %208 = vmatprep.subr.bf16.mxu0 %v207_v27  ;;  %s224_s0 = scalar_lea.vmem %s147_s9, 128  ;;  %p229_p1 = scmp.lt.s32.totalorder %s147_s9, %s147_s9 }
  0x13   :  { %p225_p0 = scmp.ne.s32.totalorder %s147_s9, %s224_s0  ;;  %p230_p2 = scmp.lt.s32.totalorder %s224_s0, %s224_s0 }
  0x15   :  { %210 = vmatpush3.bf16.msra.mxu0 %v209_v32  ;;  %p231_p3 = por %p230_p2, %p229_p1 }
  0x16   :  { %212 = vmatprep.subr.bf16.mxu0 %v211_v33 }
  0x17   :  { %p232_p4 = pnand %p231_p3, %p225_p0 }
  0x19   :  { %214 = vmatpush3.bf16.msra.mxu0 %v213_v38 }
  0x1a   :  { %216 = vmatprep.subr.bf16.mxu0 %v215_v39 }
  0x1d   :  { %218 = vmatpush3.bf16.msra.mxu0 %v217_v44 }
  0x1e   :  { %220 = vmatprep.subr.bf16.mxu0 %v219_v45 }
  0x21   :  { %222 = vmatpush3.bf16.msra.mxu0 %v221_v48 }
  0x24   :  { %117 = vmatmul.mubr.f32.vlgmr.msra.gmra.mrb[0].mxu0 %v18_v49 }
  0xf7   :  { %v188_v50 = vpop.f32.mrb[0].mxu0 }
  0xf8   :  { %v189_v51 = vpop.f32.mrb[1].mxu0 }
  0xf9   :  { %v190_v53 = vadd.f32 %v189_v51, %v188_v50 }
  0xfb   :  { %v129_v55 = vmul.f32 %v190_v53, %v154_v52 }
  0xfd   :  { %v137_v56 = vsub.f32 %v129_v55, %v155_v54 }
  0xff   :  { %139 = vst.msk [vmem:[#allocation2] sm:$0xff] %vm138_vm0, %v137_v56 }
 0x100   :  { %235 = shalt.err (!%p232_p4)
}
 0x101   :  { %s236_s11 = scalar_lea.hbm %s398_s4, 128 }
 0x102   :  { %p237_p5 = scmp.ne.s32.totalorder %s398_s4, %s236_s11  ;;  %p240_p6 = scmp.lt.u32.totalorder %s236_s11, %s398_s4 }
 0x104   :  { %p242_p7 = pnand %p240_p6, %p237_p5 }
 0x106   :  { %245 = shalt.err (!%p242_p7)
}
 0x107   :  { %149 = dma.vmem_to_hbm [thread:$0]  %s147_s9, 128, %s398_s4, [#allocation3]  }
 0x108   :  { %246 = dma.done.wait [#allocation3], 128  }
 0x109   :  { %247 = vsyncadd [#allocation3], 4294967168 }
 0x10a   :  { %153 = vsyncpa [#allocation3], 1 }

</bundles_post_ra>
